<compile_context>
chip_gen: v7x
topology: tpu7x:2x2x1
jax: 0.10.0
libtpu: 0.0.40
codegen_flags: <defaults>
</compile_context>

<pallas_src>
import functools

import jax
import jax.numpy as jnp
from jax.experimental import pallas as pl
from jax.experimental.pallas import tpu as pltpu


def _round_up(x, m):
    return -(-x // m) * m


def _mlp_kernel(dims, d_out_pad, start, vpu_first, bias_off, chunk_n, n_chunks,
                compute_dtype, has_mxu, *refs):
    # refs = (x_ref, fpack_ref[, wpack_ref], out_ref)
    #   x_ref    : (d_in, block_n)  f32, feature-major (batch on 128-lane axis)
    #   fpack_ref: (Db, bias_off + n_layers) f32  [W0' cols | biases]
    #   wpack_ref: (n_mxu, Wrow, Wcol) compute_dtype, zero-padded MXU weights
    #   out_ref  : (d_out_pad, block_n) f32, lane-dense + full-sublane slab
    x_ref = refs[0]
    fpack_ref = refs[1]
    wpack_ref = refs[2] if has_mxu else None
    out_ref = refs[-1]

    n_layers = len(dims) - 1
    d_in = dims[0]
    d1_eff = d_out_pad if n_layers == 1 else dims[1]

    # ---- hoisted parameter loads: tiny, live in vregs across the chunk loop ----
    w0_cols = None
    if vpu_first:
        w0_cols = [fpack_ref[:d1_eff, i:i + 1] for i in range(d_in)]      # f32 (d1,1)
    b_cols = []
    for l in range(n_layers):
        dout = d_out_pad if l == n_layers - 1 else dims[l + 1]
        b_cols.append(fpack_ref[:dout, bias_off + l:bias_off + l + 1])    # f32 (dout,1)
    w_mats = []
    for i, l in enumerate(range(start, n_layers)):
        dout = d_out_pad if l == n_layers - 1 else dims[l + 1]
        w_mats.append(wpack_ref[i, :dout, :dims[l]])                      # compute_dtype

    def process(col):
        xs = x_ref[:, col:col + chunk_n]
        if vpu_first:
            # Tiny contraction dim (K = d_in <= 8): d_in broadcast FMAs on the
            # VPU, in full f32 so the folded min-max normalization stays exact.
            xf = xs.astype(jnp.float32)
            acc = b_cols[0] + w0_cols[0] * xf[0:1, :]
            for i in range(1, d_in):
                acc = acc + w0_cols[i] * xf[i:i + 1, :]
            if n_layers == 1:
                h = acc
            else:
                h = jnp.tanh(acc.astype(compute_dtype))   # tanh in compute dtype (EUP)
        else:
            h = xs.astype(compute_dtype)
        for i, l in enumerate(range(start, n_layers)):
            # dtype-homogeneous dot (w and h both compute_dtype), f32 accumulation.
            acc = jnp.dot(w_mats[i], h, preferred_element_type=jnp.float32) + b_cols[l]
            if l < n_layers - 1:
                h = jnp.tanh(acc.astype(compute_dtype))
            else:
                h = acc                                   # last layer: no act, f32
        out_ref[:, col:col + chunk_n] = h.astype(out_ref.dtype)

    # Static (fully unrolled) chunk loop over lane sub-chunks; n_chunks <= 4 by
    # construction so the per-chunk live set stays inside the register file.
    for c in range(n_chunks):
        process(c * chunk_n)


def real_value_dnn_forward(x, lb, ub, weights, biases, *, block_n=None,
                           compute_dtype=jnp.float32):
    """Pallas forward of RealVaulueDNN.

    x       : (N, d_in) float32 collocation points.
    lb, ub  : (d_in,) float32 domain bounds.
    weights : list of (d_{l+1}, d_l) float32 -- PyTorch nn.Linear layout (out, in).
    biases  : list of (d_{l+1},) float32.
    compute_dtype : hidden weight/activation dtype. jnp.bfloat16 recommended on
        v6e/v7x (f32 MXU accumulation, f32 layer 0 and output); float32 on v5e.
    Returns (N, d_out) float32.
    """
    N, d_in = x.shape
    n_layers = len(weights)
    dims = [d_in] + [int(w.shape[0]) for w in weights]
    d_out = dims[-1]
    d_out_pad = _round_up(max(d_out, 8), 8)

    # ---- batch tiling: few fat grid steps + static in-kernel chunk loop ----
    chunk_n = 256 if compute_dtype == jnp.float32 else 512
    if block_n is None:
        if N <= chunk_n:
            block_n = N
        else:
            assert N % chunk_n == 0, "N must be a multiple of the chunk width"
            total_chunks = N // chunk_n
            cpb = min(4, total_chunks)            # <=4 chunks/step: no vreg spills
            while cpb > 1 and total_chunks % cpb != 0:
                cpb -= 1
            if total_chunks // cpb == 1 and cpb > 1:
                # keep >= 2 grid steps so both v7x TensorCores get work
                cpb = cpb // 2 if cpb % 2 == 0 else 1
            block_n = cpb * chunk_n
    block_n = min(block_n, N)
    assert N % block_n == 0, "batch must be divisible by block_n"
    assert block_n % 128 == 0 or block_n == N, "block_n must be lane aligned"
    chunk_n = min(chunk_n, block_n)
    if block_n % chunk_n != 0:
        chunk_n = block_n
    n_chunks = block_n // chunk_n

    # ---- fold (x - lb)/(ub - lb) into layer 0 (all f32) ----
    # Matches the reference exactly: ub == lb yields inf/nan, just like PyTorch.
    lb32 = lb.astype(jnp.float32)
    ub32 = ub.astype(jnp.float32)
    scale = 1.0 / (ub32 - lb32)
    w0f = weights[0].astype(jnp.float32) * scale[None, :]
    b0f = biases[0].astype(jnp.float32) - w0f @ lb32

    vpu_first = d_in <= 8
    start = 1 if vpu_first else 0
    bias_off = d_in if vpu_first else 0

    all_w = [w0f] + [w.astype(jnp.float32) for w in weights[1:]]
    all_b = [b0f] + [b.astype(jnp.float32) for b in biases[1:]]

    # ---- pack ALL parameters into 2 resident VMEM operands ----
    Db = max(d_out_pad, *(dims[l + 1] for l in range(n_layers)))
    if vpu_first:
        Db = max(Db, dims[1])
    Db = _round_up(Db, 8)
    fpack = jnp.zeros((Db, bias_off + n_layers), jnp.float32)
    if vpu_first:
        fpack = fpack.at[:dims[1], :d_in].set(w0f)
    for l in range(n_layers):
        fpack = fpack.at[:dims[l + 1], bias_off + l].set(all_b[l])

    has_mxu = start < n_layers
    wpack = None
    if has_mxu:
        Wrow = _round_up(
            max(d_out_pad if l == n_layers - 1 else dims[l + 1]
                for l in range(start, n_layers)), 8)
        Wcol = max(dims[l] for l in range(start, n_layers))
        wpack = jnp.zeros((n_layers - start, Wrow, Wcol), jnp.float32)
        for i, l in enumerate(range(start, n_layers)):
            w = all_w[l]
            wpack = wpack.at[i, :w.shape[0], :w.shape[1]].set(w)
        wpack = wpack.astype(compute_dtype)

    # Feature-major layout: batch on the 128-lane axis; x kept f32 so the
    # folded normalization in layer 0 is f32-exact even on the bf16 path.
    x_t = x.T.astype(jnp.float32)                        # (d_in, N)

    args = [x_t, fpack]
    in_specs = [pl.BlockSpec((d_in, block_n), lambda i: (0, i)),
                pl.BlockSpec(fpack.shape, lambda i: (0, 0))]
    if has_mxu:
        args.append(wpack)
        in_specs.append(pl.BlockSpec(wpack.shape, lambda i: (0, 0, 0)))

    out_spec = pl.BlockSpec((d_out_pad, block_n), lambda i: (0, i))

    kernel = functools.partial(_mlp_kernel, tuple(dims), d_out_pad, start,
                               vpu_first, bias_off, chunk_n, n_chunks,
                               compute_dtype, has_mxu)
    out_t = pl.pallas_call(
        kernel,
        out_shape=jax.ShapeDtypeStruct((d_out_pad, N), jnp.float32),
        grid=(N // block_n,),
        in_specs=in_specs,
        out_specs=out_spec,
        compiler_params=pltpu.CompilerParams(
            dimension_semantics=("parallel",)),
    )(*args)

    return out_t[:d_out, :].T                            # (N, d_out)


def _reference_forward(x, lb, ub, weights, biases):
    # Pure-JAX reference, PyTorch (out, in) weight layout, explicit normalization.
    h = (x - lb[None, :]) / (ub[None, :] - lb[None, :])
    for i, (w, b) in enumerate(zip(weights, biases)):
        h = h @ w.T + b[None, :]
        if i < len(weights) - 1:
            h = jnp.tanh(h)
    return h


if __name__ == "__main__":
    # PINN-style architecture: layers = [2, 32, 32, 32, 1], activation='tanh'
    layers = [2, 32, 32, 32, 1]

    key = jax.random.PRNGKey(0)
    keys = jax.random.split(key, 2 * (len(layers) - 1) + 1)

    weights, biases = [], []
    for i in range(len(layers) - 1):
        fan_in, fan_out = layers[i], layers[i + 1]
        bound = 1.0 / jnp.sqrt(jnp.float32(fan_in))
        # PyTorch nn.Linear layout: weight (out, in), bias (out,)
        w = jax.random.uniform(keys[2 * i], (fan_out, fan_in),
                               minval=-bound, maxval=bound, dtype=jnp.float32)
        b = jax.random.uniform(keys[2 * i + 1], (fan_out,),
                               minval=-bound, maxval=bound, dtype=jnp.float32)
        weights.append(w)
        biases.append(b)

    lb = jnp.array([-1.0, 0.0], dtype=jnp.float32)
    ub = jnp.array([1.0, 2.0], dtype=jnp.float32)

    N_big = 2048
    x_big = jax.random.uniform(keys[-1], (N_big, layers[0]),
                               minval=lb, maxval=ub, dtype=jnp.float32)
    x_small = x_big[:512]

    ref_small = _reference_forward(x_small, lb, ub, weights, biases)
    ref_big = _reference_forward(x_big, lb, ub, weights, biases)

    # f32 path, small batch: heuristic picks block_n=256 -> grid of 2 (both
    # v7x TCs), 1 chunk per step.  Tolerance accounts for TPU MXU f32 passes.
    out = jax.block_until_ready(
        real_value_dnn_forward(x_small, lb, ub, weights, biases,
                               compute_dtype=jnp.float32))
    assert out.shape == (512, layers[-1])
    assert jnp.allclose(out, ref_small, atol=2e-3, rtol=2e-3), "f32 mismatch"

    # f32 path, larger batch: exercises the in-kernel static chunk loop
    # (block_n=1024, grid of 2, 4 chunks of 256 per step).
    out_big = jax.block_until_ready(
        real_value_dnn_forward(x_big, lb, ub, weights, biases,
                               compute_dtype=jnp.float32))
    assert out_big.shape == (N_big, layers[-1])
    assert jnp.allclose(out_big, ref_big, atol=2e-3, rtol=2e-3), "f32(big) mismatch"

    # bf16 hidden path (recommended on v6e/v7x): bf16 weights + bf16 tanh,
    # f32 MXU accumulation, f32 layer 0 / normalization / output.
    out_bf16 = jax.block_until_ready(
        real_value_dnn_forward(x_small, lb, ub, weights, biases,
                               compute_dtype=jnp.bfloat16))
    assert jnp.allclose(out_bf16, ref_small, atol=5e-2, rtol=5e-2), "bf16 mismatch"

    print("KERNEL_OK")
</pallas_src>

<mosaic_0001>
module attributes {stable_mosaic.version = 11 : i64} {
  func.func @_mlp_kernel(%arg0: i32, %arg1: memref<2x256xf32, #tpu.memory_space<vmem>>, %arg2: memref<32x6xf32, #tpu.memory_space<vmem>>, %arg3: memref<3x32x32xf32, #tpu.memory_space<vmem>>, %arg4: memref<8x256xf32, #tpu.memory_space<vmem>>) attributes {dimension_semantics = [#tpu.dimension_semantics<parallel>], iteration_bounds = array<i64: 2>, scalar_prefetch = 0 : i64, scratch_operands = 0 : i64, tpu.core_type = #tpu.core_type<tc>, window_params = [{transform_indices = @transform_0, window_bounds = array<i64: 2, 256>}, {pipeline_mode = #tpu.pipeline_mode<synchronous>, transform_indices = @transform_1, window_bounds = array<i64: 32, 6>}, {pipeline_mode = #tpu.pipeline_mode<synchronous>, transform_indices = @transform_2, window_bounds = array<i64: 3, 32, 32>}, {transform_indices = @transform_3, window_bounds = array<i64: 8, 256>}]} {
    %c0 = arith.constant 0 : index
    %c0_0 = arith.constant 0 : index
    %0 = vector.load %arg2[%c0, %c0_0] : memref<32x6xf32, #tpu.memory_space<vmem>>, vector<32x1xf32>
    %c0_1 = arith.constant 0 : index
    %c1 = arith.constant 1 : index
    %1 = vector.load %arg2[%c0_1, %c1] : memref<32x6xf32, #tpu.memory_space<vmem>>, vector<32x1xf32>
    %c0_2 = arith.constant 0 : index
    %c2 = arith.constant 2 : index
    %2 = vector.load %arg2[%c0_2, %c2] : memref<32x6xf32, #tpu.memory_space<vmem>>, vector<32x1xf32>
    %c0_3 = arith.constant 0 : index
    %c3 = arith.constant 3 : index
    %3 = vector.load %arg2[%c0_3, %c3] : memref<32x6xf32, #tpu.memory_space<vmem>>, vector<32x1xf32>
    %c0_4 = arith.constant 0 : index
    %c4 = arith.constant 4 : index
    %4 = vector.load %arg2[%c0_4, %c4] : memref<32x6xf32, #tpu.memory_space<vmem>>, vector<32x1xf32>
    %c0_5 = arith.constant 0 : index
    %c5 = arith.constant 5 : index
    %5 = vector.load %arg2[%c0_5, %c5] : memref<32x6xf32, #tpu.memory_space<vmem>>, vector<8x1xf32>
    %c0_6 = arith.constant 0 : index
    %c0_7 = arith.constant 0 : index
    %c0_8 = arith.constant 0 : index
    %6 = vector.load %arg3[%c0_6, %c0_7, %c0_8] : memref<3x32x32xf32, #tpu.memory_space<vmem>>, vector<1x32x32xf32>
    %7 = vector.shape_cast %6 : vector<1x32x32xf32> to vector<32x32xf32>
    %c1_9 = arith.constant 1 : index
    %c0_10 = arith.constant 0 : index
    %c0_11 = arith.constant 0 : index
    %8 = vector.load %arg3[%c1_9, %c0_10, %c0_11] : memref<3x32x32xf32, #tpu.memory_space<vmem>>, vector<1x32x32xf32>
    %9 = vector.shape_cast %8 : vector<1x32x32xf32> to vector<32x32xf32>
    %c2_12 = arith.constant 2 : index
    %c0_13 = arith.constant 0 : index
    %c0_14 = arith.constant 0 : index
    %10 = vector.load %arg3[%c2_12, %c0_13, %c0_14] : memref<3x32x32xf32, #tpu.memory_space<vmem>>, vector<1x8x32xf32>
    %11 = vector.shape_cast %10 : vector<1x8x32xf32> to vector<8x32xf32>
    %c0_15 = arith.constant 0 : index
    %c0_16 = arith.constant 0 : index
    %12 = vector.load %arg1[%c0_15, %c0_16] : memref<2x256xf32, #tpu.memory_space<vmem>>, vector<2x256xf32>
    %13 = vector.extract_strided_slice %12 {offsets = [0, 0], sizes = [1, 256], strides = [1, 1]} : vector<2x256xf32> to vector<1x256xf32>
    %14 = vector.broadcast %0 : vector<32x1xf32> to vector<32x256xf32>
    %15 = vector.broadcast %13 : vector<1x256xf32> to vector<32x256xf32>
    %16 = arith.mulf %14, %15 : vector<32x256xf32>
    %17 = vector.broadcast %2 : vector<32x1xf32> to vector<32x256xf32>
    %18 = arith.addf %17, %16 : vector<32x256xf32>
    %19 = vector.extract_strided_slice %12 {offsets = [1, 0], sizes = [1, 256], strides = [1, 1]} : vector<2x256xf32> to vector<1x256xf32>
    %20 = vector.broadcast %1 : vector<32x1xf32> to vector<32x256xf32>
    %21 = vector.broadcast %19 : vector<1x256xf32> to vector<32x256xf32>
    %22 = arith.mulf %20, %21 : vector<32x256xf32>
    %23 = arith.addf %18, %22 : vector<32x256xf32>
    %24 = math.tanh %23 : vector<32x256xf32>
    %cst = arith.constant dense<0.000000e+00> : vector<32x256xf32>
    %25 = tpu.matmul %7, %24, %cst {dimension_numbers = #tpu.dot_dimension_numbers<[1], [0], [0], [1], [0, 0, 1, 1], [], []>} : vector<32x32xf32>, vector<32x256xf32>, vector<32x256xf32> -> vector<32x256xf32>
    %26 = vector.broadcast %3 : vector<32x1xf32> to vector<32x256xf32>
    %27 = arith.addf %25, %26 : vector<32x256xf32>
    %28 = math.tanh %27 : vector<32x256xf32>
    %cst_17 = arith.constant dense<0.000000e+00> : vector<32x256xf32>
    %29 = tpu.matmul %9, %28, %cst_17 {dimension_numbers = #tpu.dot_dimension_numbers<[1], [0], [0], [1], [0, 0, 1, 1], [], []>} : vector<32x32xf32>, vector<32x256xf32>, vector<32x256xf32> -> vector<32x256xf32>
    %30 = vector.broadcast %4 : vector<32x1xf32> to vector<32x256xf32>
    %31 = arith.addf %29, %30 : vector<32x256xf32>
    %32 = math.tanh %31 : vector<32x256xf32>
    %cst_18 = arith.constant dense<0.000000e+00> : vector<8x256xf32>
    %33 = tpu.matmul %11, %32, %cst_18 {dimension_numbers = #tpu.dot_dimension_numbers<[1], [0], [0], [1], [0, 0, 1, 1], [], []>} : vector<8x32xf32>, vector<32x256xf32>, vector<8x256xf32> -> vector<8x256xf32>
    %34 = vector.broadcast %5 : vector<8x1xf32> to vector<8x256xf32>
    %35 = arith.addf %33, %34 : vector<8x256xf32>
    %c0_19 = arith.constant 0 : index
    %c0_20 = arith.constant 0 : index
    %36 = vector.load %arg4[%c0_19, %c0_20] : memref<8x256xf32, #tpu.memory_space<vmem>>, vector<8x256xf32>
    tpu.vector_store %arg4[%c0_19, %c0_20], %35 {strides = array<i32>} : memref<8x256xf32, #tpu.memory_space<vmem>>, vector<8x256xf32>,
    return
  }
  func.func @transform_0(%arg0: i32) -> (i32, i32) {
    %c0_i32 = arith.constant 0 : i32
    %c0_i32_0 = arith.constant 0 : i32
    return %c0_i32, %arg0 : i32, i32
  }
  func.func @transform_1(%arg0: i32) -> (i32, i32) {
    %c0_i32 = arith.constant 0 : i32
    %c0_i32_0 = arith.constant 0 : i32
    %c0_i32_1 = arith.constant 0 : i32
    return %c0_i32, %c0_i32_0 : i32, i32
  }
  func.func @transform_2(%arg0: i32) -> (i32, i32, i32) {
    %c0_i32 = arith.constant 0 : i32
    %c0_i32_0 = arith.constant 0 : i32
    %c0_i32_1 = arith.constant 0 : i32
    %c0_i32_2 = arith.constant 0 : i32
    return %c0_i32, %c0_i32_0, %c0_i32_1 : i32, i32, i32
  }
  func.func @transform_3(%arg0: i32) -> (i32, i32) {
    %c0_i32 = arith.constant 0 : i32
    %c0_i32_0 = arith.constant 0 : i32
    return %c0_i32, %arg0 : i32, i32
  }
}

</mosaic_0001>

<bundles_post_ra>
// kernel: tpu_custom_call.1
= control target key start
LH: loop header
LB: loop body
LE: loop exit
PB: predicated region body
PF: predicated region fallthrough
CT: control target
= control target key end

     0   :  { %8 = vsyncpa [#allocation3], 0  ;;  %s1237_s0 = inlined_call_operand.vmem [shape: f32[2,512], index: 0, kind: input, shape index: {}]   ;;  %s1238_s1 = inlined_call_operand.vmem [shape: f32[32,6], index: 1, kind: input, shape index: {}]   ;;  %s1239_s2 = inlined_call_operand.hbm [shape: f32[3,32,32], index: 2, kind: input, shape index: {}]   ;;  %s1240_s3 = inlined_call_operand.hbm [shape: f32[8,512], index: 3, kind: output, shape index: {}]  }
   0x1   :  { %9 = vsyncpa [#allocation4], 0 }
   0x2   :  { %11 = vsyncpa [#allocation4 + $0x1], 0  ;;  %s1044_s12 = smov 0   ;;  %s1046_s13 = smov 0  }
   0x3   :  { %s1048_s14 = smov 0   ;;  %s1050_s15 = smov 0  }
   0x4 LB: > { %s1065_s16 = sadd.s32 4294967295, %s1011_s15   ;;  %s749_s17 = sadd.s32 4294967294, %s1011_s15   ;;  %s1011_s15 = sphi %s1050_s15, %s1256_s15   ;;  %s1007_s14 = sphi %s1048_s14, %s1255_s14   ;;  %s1003_s13 = sphi %s1046_s13, %s1254_s13   ;;  %s999_s12 = sphi %s1044_s12, %s1253_s12  }
   0x5   : > { %s1069_s18 = sadd.s32 1, %s1011_s15   ;;  %s92_s19 = sadd.s32 1, %s1007_s14 }
   0x6   : > { %s89_s20 = ssub.s32 %s1011_s15, %s1069_s18  ;;  %p102_p0 = scmp.ne.s32.totalorder %s1007_s14, %s1003_s13 }
   0x7   : > { %p90_p1 = scmp.eq.s32.totalorder %s89_s20, 0  ;;  %p103_p2 = scmp.eq.s32.totalorder %s1065_s16, 1 }
   0x8   : > { %p108_p3 = scmp.ne.s32.totalorder %s1003_s13, %s999_s12  ;;  %p109_p4 = scmp.eq.s32.totalorder %s749_s17, 1 }
   0x9   : > { %s1080_s21 = scalar_select %p90_p1, %s1007_s14, %s92_s19  }
   0xa   : > { %p1082_p5 = por %p103_p2, %p102_p0  ;;  %p1086_p6 = por %p109_p4, %p108_p3 }
   0xb   : > { %p750_p7 = scmp.ge.s32.totalorder %s1011_s15, 1  ;;  %p116_p8 = scmp.lt.s32.totalorder %s1011_s15, 3 }
   0xc   : > { %s1244_s22 = scalar_select %p1082_p5, 1, 0 }
   0xd   : > { %s1245_s23 = scalar_select %p1086_p6, 1, 0 }
   0xe   : > { %p1241_p9 = scmp.eq.s32.totalorder %s1065_s16, 0  ;;  %p1093_p10 = pnand %p750_p7, %p116_p8 }
   0xf   : > { %s1013_s25 = smov [#allocation2]   ;;  %s917_s30 = scalar_lea.hbm %s1239_s2, 1536 }
  0x10   : > { %s1246_s24 = scalar_select %p1093_p10, 1, 0 }
  0x11   : > { %s131_s26 = sshll.u32 %s1013_s25, 4  ;;  %p803_p11 = pneg %p1093_p10  ;;  %s132_s26 = int_to_ptr.vmem [resolvable:$true] %s131_s26 }
  0x12   : > { %p918_p13 = scmp.ne.s32.totalorder %s1239_s2, %s917_s30  ;;  %p924_p3 = scmp.lt.u32.totalorder %s917_s30, %s1239_s2 }
  0x13   : > { %p1101_p12 = pnand %p1241_p9, %p803_p11 }
  0x15   : > { %p919_p0 = pneg %p1101_p12 }
  0x17   : > { %p920_p1 = pnand %p919_p0, %p918_p13 }
  0x19   : > { %p921_p2 = pneg %p920_p1 }
  0x1b   : > { %p926_p4 = pnand %p924_p3, %p921_p2 }
  0x1d   : > { %929 = shalt.err (!%p926_p4)
}
  0x1e   : > { %s930_s8 = scalar_lea.vmem %s132_s26, 1536  ;;  %p938_p9 = scmp.lt.s32.totalorder %s132_s26, %s132_s26 }
  0x1f   : > { %p931_p7 = scmp.ne.s32.totalorder %s132_s26, %s930_s8  ;;  %p939_p6 = scmp.lt.s32.totalorder %s930_s8, %s930_s8 }
  0x21   : > { %p933_p8 = pnand %p931_p7, %p919_p0  ;;  %p940_p5 = por %p939_p6, %p938_p9 }
  0x23   : > { %p934_p11 = pneg %p933_p8 }
  0x25   : > { %p941_p10 = pnand %p940_p5, %p934_p11 }
  0x27   : > { %944 = shalt.err (!%p941_p10)
}
  0x28   : > { %s1014_s9 = smov 128   ;;  %s1015_s10 = smov 8  }
  0x29   : > { %806 = dma.hbm_to_vmem [thread:$0]  (!%p1101_p12), %s1239_s2, 1536, %s132_s26, [#allocation3], %s1014_s9, %s1014_s9, %s1015_s10  }
  0x2a   : > { %p1248_p13 = scmp.ne.s32.totalorder %s1246_s24, 0 }
  0x2b   : > { %p1249_p1 = scmp.eq.s32.totalorder (!%p1248_p13), %s1065_s16, 0 }
  0x2c   : > { %156 = sbr.rel (%p1248_p13) target bundleno = 949 (0x3b5), region = 32 }
  0x33   : > { %990 = dma.done.wait (%p1249_p1), [#allocation3], 1536   ;;  %p1250_p0 = pmov %p1249_p1 }
  0x34   : > { %v1016_v0 = vmov 2   ;;  %v1017_v1 = vmov 0   ;;  %v1130_v2 = vld [vmem:[%s1238_s1] sm:$0xff]  ;;  %v1137_v3 = vld [vmem:[%s1238_s1 + $0x8] sm:$0xff]  ;;  %v1144_v4 = vld [vmem:[%s1238_s1 + $0x18] sm:$0xff]  ;;  %v1018_v5 = vmov 1   ;;  %v224_v9 = vlaneseq }
  0x35   : > { %992 = vsyncadd (%p1250_p0), [#allocation3], 4294965760  ;;  %857 = vset.pattern.permute.xlu1 %v1016_v0  ;;  %856 = vset.pattern.permute.xlu0 %v1017_v1  ;;  %v1151_v6 = vld [vmem:[%s1238_s1 + $0x10] sm:$0xff]  ;;  %v1019_v7 = vmov 0.0   ;;  %v1020_v8 = vmov 3   ;;  %s756_s30 = sshll.u32 %s1065_s16, 1 }
  0x36   : > { %251 = vperm.xlu1 %857, %v1130_v2   ;;  %205 = vperm.xlu0 %856, %v1130_v2   ;;  %p181_p5 = scmp.lt.s32.totalorder %s756_s30, 3  ;;  %v225_v10 = vshrl.u32 %v224_v9, 7  ;;  %vm348_vm0 = vcmask 261120   ;;  %s177_s8 = sand.u32 1, %s1003_s13  }
  0x37   : > { %425 = vmatprep.mubr.f32.mxu0 %v1019_v7  ;;  %550 = vmatprep.mubr.f32.mxu1 %v1019_v7  ;;  %s755_s9 = sshll.u32 %s177_s8, 4  ;;  %s772_s10 = sshll.u32 %s1065_s16, 8 }
  0x38   : > { %s1258_s30 = smov (!%p181_p5, %s756_s30), 3  ;;  %v226_v11 = vsub.s32 0, %v225_v10  ;;  %v230_v13 = vsub.s32 2, %v225_v10  ;;  %v292_v14 = vsub.s32 1, %v225_v10  ;;  %v296_v15 = vsub.s32 3, %v225_v10  ;;  %s179_s11 = scalar_lea.vmem [#allocation5], %s755_s9 }
  0x39   : > { %s757_s4 = sshll.u32 %s1258_s30, 1  ;;  %s678_s17 = sshll.u32 %s179_s11, 4  ;;  %s1197_s17 = int_to_ptr.vmem [resolvable:$true] %s678_s17 }
  0x3a   : > { %255 = vperm.xlu1 %857, %v1137_v3   ;;  %210 = vperm.xlu0 %856, %v1137_v3   ;;  %s184_s7 = scalar_lea.vmem %s1237_s0, %s757_s4  ;;  %s1195_s24 = scalar_lea.hbm %s1240_s3, %s772_s10 }
  0x3b   : > { %v202_v12 = vld [vmem:[%s184_s7] sm:$0xf]  ;;  %s664_s25 = scalar_lea.sflag [#allocation4], %s177_s8  ;;  %s945_s16 = scalar_lea.vmem %s1197_s17, 256 }
  0x3c   : > { %v227_v17 = vrot.slane %v202_v12, %v226_v11  ;;  %v231_v19 = vrot.slane %v202_v12, %v230_v13  ;;  %v293_v20 = vrot.slane %v202_v12, %v292_v14  ;;  %v297_v21 = vrot.slane %v202_v12, %v296_v15  ;;  %p946_p6 = scmp.ne.s32.totalorder %s1197_s17, %s945_s16  ;;  %p1251_p9 = scmp.ne.s32.totalorder %s1244_s22, 0 }
  0x3d   : > { %s1023_s26 = smov [#allocation5]  }
  0x3e   : > { %858 = vset.pattern.permute.xlu1 %v1018_v5  ;;  %220 = vperm.xlu0 %856, %v1144_v4   ;;  %v237_v22 = vrot.slane %v227_v17, %v226_v11  ;;  %v241_v25 = vrot.slane %v231_v19, %v226_v11  ;;  %v303_v27 = vrot.slane %v293_v20, %v292_v14  ;;  %p947_p10 = pnand %p946_p6, %p1251_p9  ;;  %s949_s27 = sshll.u32 %s1023_s26, 4  ;;  %s950_s27 = int_to_ptr.vmem [resolvable:$false] %s949_s27 }
  0x3f   : > { %279 = vperm.xlu1 %858, %v1137_v3   ;;  %v307_v28 = vrot.slane %v297_v21, %v292_v14  ;;  %v191_v21 = vld [vmem:[#allocation2] sm:$0xff]  ;;  %s951_s28 = scalar_lea.vmem %s950_s27, 512  ;;  %p952_p2 = scmp.lt.s32.totalorder %s1197_s17, %s950_s27 }
  0x40   : > { %p948_p12 = pneg %p947_p10  ;;  %p953_p3 = scmp.lt.s32.totalorder %s951_s28, %s945_s16 }
  0x42   : > { %860 = vset.pattern.permute.xlu0 %v1018_v5  ;;  %p954_p4 = por %p953_p3, %p952_p2 }
  0x43   : > { %859 = vset.pattern.permute.xlu1 %v1017_v1  ;;  %275 = vperm.xlu0 %860, %v1130_v2  }
  0x44   : > { %215 = vperm.xlu1 %859, %v1151_v6   ;;  %p955_p7 = pnand %p954_p4, %p948_p12 }
  0x47   : > { %283 = vperm.xlu0 %860, %v1151_v6  }
  0x48   : > { %861 = vset.pattern.permute.xlu1 %v1016_v0 }
  0x49   : > { %259 = vperm.xlu1 %861, %v1151_v6  }
  0x4b   : > { %864 = vset.pattern.permute.xlu0 %v1020_v8 }
  0x4c   : > { %337 = vperm.xlu0 %864, %v1137_v3  }
  0x4d   : > { %263 = vperm.xlu1 %861, %v1144_v4  }
  0x51   : > { %862 = vset.pattern.permute.xlu1 %v1018_v5 }
  0x52   : > { %287 = vperm.xlu1 %862, %v1144_v4  }
  0x56   : > { %863 = vset.pattern.permute.xlu1 %v1020_v8 }
  0x57   : > { %333 = vperm.xlu1 %863, %v1130_v2  }
  0x5b   : > { %341 = vperm.xlu1 %863, %v1151_v6  }
  0x5f   : > { %345 = vperm.xlu1 %863, %v1144_v4  }
  0xb5   : > { %v252_v16 = vpop.permute.xlu1 %251  ;;  %v206_v18 = vpop.permute.xlu0 %205 }
  0xb6   : > { %v242_v31 = vmul.f32 %v237_v22, %v206_v18  ;;  %v243_v33 = vmul.f32 %v241_v25, %v206_v18 }
  0xb8   : > { %v266_v41 = vadd.f32 %v252_v16, %v242_v31  ;;  %v267_v42 = vadd.f32 %v252_v16, %v243_v33 }
  0xb9   : > { %v256_v23 = vpop.permute.xlu1 %255  ;;  %v211_v24 = vpop.permute.xlu0 %210 }
  0xba   : > { %v244_v26 = vmul.f32 %v237_v22, %v211_v24  ;;  %v245_v29 = vmul.f32 %v241_v25, %v211_v24  ;;  %v194_v24 = vld [vmem:[#allocation2 + $0x18] sm:$0xff] }
  0xbc   : > { %v268_v34 = vadd.f32 %v256_v23, %v244_v26  ;;  %v269_v37 = vadd.f32 %v256_v23, %v245_v29  ;;  %v193_v23 = vld [vmem:[#allocation2 + $0x10] sm:$0xff] }
  0xbd   : > { %v221_v30 = vpop.permute.xlu0 %220 }
  0xbe   : > { %v280_v32 = vpop.permute.xlu1 %279  ;;  %v248_v58 = vmul.f32 %v237_v22, %v221_v30  ;;  %v249_v60 = vmul.f32 %v241_v25, %v221_v30 }
  0xbf   : > { %v310_v35 = vmul.f32 %v303_v27, %v280_v32  ;;  %v311_v36 = vmul.f32 %v307_v28, %v280_v32 }
  0xc1   : > { %v318_v38 = vadd.f32 %v310_v35, %v268_v34  ;;  %v319_v39 = vadd.f32 %v311_v36, %v269_v37 }
  0xc2   : > { %v276_v40 = vpop.permute.xlu0 %275 }
  0xc3   : > { %v308_v43 = vmul.f32 %v303_v27, %v276_v40  ;;  %v309_v44 = vmul.f32 %v307_v28, %v276_v40  ;;  %v216_v45 = vpop.permute.xlu1 %215  ;;  %869 = vtanh.f32 %v318_v38 }
  0xc4   : > { %871 = vtanh.f32 %v319_v39  ;;  %v246_v50 = vmul.f32 %v237_v22, %v216_v45  ;;  %v247_v51 = vmul.f32 %v241_v25, %v216_v45  ;;  %v192_v22 = vld [vmem:[#allocation2 + $0x8] sm:$0xff]  ;;  %v1021_v25 = vmov 4  }
  0xc5   : > { %v316_v46 = vadd.f32 %v308_v43, %v266_v41  ;;  %v317_v47 = vadd.f32 %v309_v44, %v267_v42  ;;  %865 = vset.pattern.permute.xlu0 %v1021_v25  ;;  %866 = vset.pattern.permute.xlu1 %v1021_v25 }
  0xc6   : > { %v284_v49 = vpop.permute.xlu0 %283  ;;  %459 = vperm.xlu0 %865, %v1130_v2   ;;  %463 = vperm.xlu1 %866, %v1137_v3  }
  0xc7   : > { %873 = vtanh.f32 %v316_v46  ;;  %v312_v53 = vmul.f32 %v303_v27, %v284_v49  ;;  %v313_v56 = vmul.f32 %v307_v28, %v284_v49 }
  0xc8   : > { %875 = vtanh.f32 %v317_v47  ;;  %v260_v48 = vpop.permute.xlu1 %259 }
  0xc9   : > { %v270_v52 = vadd.f32 %v260_v48, %v246_v50  ;;  %v271_v55 = vadd.f32 %v260_v48, %v247_v51 }
  0xca   : > { %467 = vperm.xlu1 %866, %v1151_v6   ;;  %471 = vperm.xlu0 %865, %v1144_v4  }
  0xcb   : > { %v320_v61 = vadd.f32 %v312_v53, %v270_v52  ;;  %v321_v63 = vadd.f32 %v313_v56, %v271_v55  ;;  %v338_v31 = vpop.permute.xlu0 %337  ;;  %v196_v55 = vld [vmem:[#allocation2 + $0x20] sm:$0xff]  ;;  %v197_v56 = vld [vmem:[#allocation2 + $0x28] sm:$0xff] }
  0xcc   : > { %v264_v54 = vpop.permute.xlu1 %263 }
  0xcd   : > { %v870_v57 = vpop.eup %869  ;;  %v272_v0 = vadd.f32 %v264_v54, %v248_v58  ;;  %v273_v8 = vadd.f32 %v264_v54, %v249_v60  ;;  %877 = vtanh.f32 %v320_v61  ;;  %v199_v58 = vld [vmem:[#allocation2 + $0x38] sm:$0xff] }
  0xce   : > { %v872_v59 = vpop.eup %871  ;;  %879 = vtanh.f32 %v321_v63 }
  0xd1   : > { %v874_v62 = vpop.eup %873  ;;  %v288_v1 = vpop.permute.xlu1 %287 }
  0xd2   : > { %v876_v5 = vpop.eup %875  ;;  %v314_v9 = vmul.f32 %v303_v27, %v288_v1  ;;  %v315_v10 = vmul.f32 %v307_v28, %v288_v1  ;;  %v775_v11 = vpack.c.bf16 %v870_v57, %v874_v62  ;;  %v198_v57 = vld [vmem:[#allocation2 + $0x30] sm:$0xff] }
  0xd3   : > { %v773_v12 = vpack.c.bf16 %v872_v59, %v876_v5  ;;  %v1022_v59 = vmov 5  }
  0xd4   : > { %v322_v13 = vadd.f32 %v314_v9, %v272_v0  ;;  %v323_v14 = vadd.f32 %v315_v10, %v273_v8  ;;  %867 = vset.pattern.permute.xlu1 %v1022_v59  ;;  %868 = vset.pattern.permute.xlu0 %v1022_v59 }
  0xd5   : > { %774 = vmatprep.subr.bf16.mxu0 %v773_v12  ;;  %584 = vperm.xlu1 %867, %v1130_v2  }
  0xd6   : > { %881 = vtanh.f32 %v322_v13  ;;  %776 = vmatpush1.bf16.msra.mxu0 %v775_v11  ;;  %v334_v26 = vpop.permute.xlu1 %333 }
  0xd7   : > { %883 = vtanh.f32 %v323_v14  ;;  %v878_v15 = vpop.eup %877 }
  0xd8   : > { %v880_v16 = vpop.eup %879 }
  0xda   : > { %v342_v35 = vpop.permute.xlu1 %341 }
  0xde   : > { %v346_v4 = vpop.permute.xlu1 %345 }
  0xe0   : > { %v882_v17 = vpop.eup %881 }
  0xe1   : > { %v884_v18 = vpop.eup %883  ;;  %v779_v19 = vpack.c.bf16 %v882_v17, %v878_v15 }
  0xe2   : > { %v777_v20 = vpack.c.bf16 %v884_v18, %v880_v16 }
  0xe4   : > { %778 = vmatprep.subr.bf16.mxu0 %v777_v20 }
  0xe5   : > { %780 = vmatpush1.bf16.msra.mxu0 %v779_v19 }
  0xe8   : > { %758 = vmatmul.mubr.msk.f32.vlgmr.msra.gmra.mrb[0].mxu0 %vm348_vm0, %v191_v21 }
  0xe9   : > { %431 = vmatprep.mubr.f32.mxu0 %v1019_v7 }
  0xec   : > { %759 = vmatmul.mubr.msk.f32.gmra.mrb[2].mxu0 %vm348_vm0, %v192_v22 }
  0xed   : > { %437 = vmatprep.mubr.f32.mxu0 %v1019_v7 }
  0xf0   : > { %760 = vmatmul.mubr.msk.f32.gmra.mrb[4].mxu0 %vm348_vm0, %v193_v23 }
  0xf1   : > { %443 = vmatprep.mubr.f32.mxu0 %v1019_v7 }
  0xf4   : > { %761 = vmatmul.mubr.msk.f32.gmra.mrb[6].mxu0 %vm348_vm0, %v194_v24 }
  0xf5   : > { %654 = vmatprep.mubr.f32.mxu0 %v1019_v7 }
 0x145   : > { %v460_v60 = vpop.permute.xlu0 %459  ;;  %v464_v62 = vpop.permute.xlu1 %463 }
 0x149   : > { %v472_v2 = vpop.permute.xlu0 %471 }
 0x1bb   : > { %v427_v27 = vpop.f32.mrb[0].mxu0 }
 0x1bc   : > { %v428_v28 = vadd.f32 %v427_v27, %v334_v26  ;;  %v429_v29 = vpop.f32.mrb[1].mxu0 }
 0x1bd   : > { %v430_v30 = vadd.f32 %v429_v29, %v334_v26 }
 0x1be   : > { %885 = vtanh.f32 %v428_v28 }
 0x1bf   : > { %v433_v32 = vpop.f32.mrb[2].mxu0  ;;  %887 = vtanh.f32 %v430_v30 }
 0x1c0   : > { %v434_v33 = vadd.f32 %v433_v32, %v338_v31  ;;  %v435_v34 = vpop.f32.mrb[3].mxu0 }
 0x1c1   : > { %v436_v36 = vadd.f32 %v435_v34, %v338_v31  ;;  %v201_v31 = vld [vmem:[#allocation2 + $0x40] sm:$0xff] }
 0x1c2   : > { %889 = vtanh.f32 %v434_v33 }
 0x1c3   : > { %891 = vtanh.f32 %v436_v36  ;;  %v439_v3 = vpop.f32.mrb[4].mxu0 }
 0x1c4   : > { %v440_v37 = vadd.f32 %v439_v3, %v342_v35  ;;  %v441_v6 = vpop.f32.mrb[5].mxu0 }
 0x1c5   : > { %v442_v38 = vadd.f32 %v441_v6, %v342_v35 }
 0x1c6   : > { %893 = vtanh.f32 %v440_v37 }
 0x1c7   : > { %v445_v39 = vpop.f32.mrb[6].mxu0  ;;  %895 = vtanh.f32 %v442_v38 }
 0x1c8   : > { %v446_v40 = vadd.f32 %v445_v39, %v346_v4  ;;  %v447_v41 = vpop.f32.mrb[7].mxu0  ;;  %v886_v43 = vpop.eup %885 }
 0x1c9   : > { %v448_v42 = vadd.f32 %v447_v41, %v346_v4  ;;  %v888_v44 = vpop.eup %887 }
 0x1ca   : > { %897 = vtanh.f32 %v446_v40 }
 0x1cb   : > { %899 = vtanh.f32 %v448_v42 }
 0x1cc   : > { %v890_v45 = vpop.eup %889 }
 0x1cd   : > { %v892_v46 = vpop.eup %891  ;;  %v783_v47 = vpack.c.bf16 %v890_v45, %v886_v43 }
 0x1ce   : > { %v781_v48 = vpack.c.bf16 %v892_v46, %v888_v44 }
 0x1d0   : > { %782 = vmatprep.subr.bf16.mxu1 %v781_v48  ;;  %v894_v49 = vpop.eup %893 }
 0x1d1   : > { %784 = vmatpush1.bf16.msra.mxu1 %v783_v47  ;;  %v896_v50 = vpop.eup %895 }
 0x1d4   : > { %v898_v51 = vpop.eup %897 }
 0x1d5   : > { %v900_v52 = vpop.eup %899  ;;  %v787_v53 = vpack.c.bf16 %v898_v51, %v894_v49 }
 0x1d6   : > { %v785_v54 = vpack.c.bf16 %v900_v52, %v896_v50 }
 0x1d8   : > { %786 = vmatprep.subr.bf16.mxu1 %v785_v54 }
 0x1d9   : > { %788 = vmatpush1.bf16.msra.mxu1 %v787_v53 }
 0x1dc   : > { %762 = vmatmul.mubr.msk.f32.vlgmr.msra.gmra.mrb[0].mxu1 %vm348_vm0, %v196_v55 }
 0x1dd   : > { %556 = vmatprep.mubr.f32.mxu1 %v1019_v7 }
 0x1e0   : > { %763 = vmatmul.mubr.msk.f32.gmra.mrb[2].mxu1 %vm348_vm0, %v197_v56 }
 0x1e1   : > { %562 = vmatprep.mubr.f32.mxu1 %v1019_v7 }
 0x1e4   : > { %764 = vmatmul.mubr.msk.f32.gmra.mrb[4].mxu1 %vm348_vm0, %v198_v57 }
 0x1e5   : > { %568 = vmatprep.mubr.f32.mxu1 %v1019_v7  ;;  %v468_v7 = vpop.permute.xlu1 %467 }
 0x1e8   : > { %765 = vmatmul.mubr.msk.f32.gmra.mrb[6].mxu1 %vm348_vm0, %v199_v58 }
 0x1e9   : > { %v585_v32 = vpop.permute.xlu1 %584 }
 0x2af   : > { %v552_v61 = vpop.f32.mrb[0].mxu1 }
 0x2b0   : > { %v553_v63 = vadd.f32 %v552_v61, %v460_v60  ;;  %v554_v0 = vpop.f32.mrb[1].mxu1 }
 0x2b1   : > { %v555_v1 = vadd.f32 %v554_v0, %v460_v60 }
 0x2b2   : > { %901 = vtanh.f32 %v553_v63 }
 0x2b3   : > { %v558_v5 = vpop.f32.mrb[2].mxu1  ;;  %903 = vtanh.f32 %v555_v1 }
 0x2b4   : > { %v559_v8 = vadd.f32 %v558_v5, %v464_v62  ;;  %v560_v9 = vpop.f32.mrb[3].mxu1 }
 0x2b5   : > { %v561_v10 = vadd.f32 %v560_v9, %v464_v62 }
 0x2b6   : > { %905 = vtanh.f32 %v559_v8 }
 0x2b7   : > { %907 = vtanh.f32 %v561_v10  ;;  %v564_v11 = vpop.f32.mrb[4].mxu1 }
 0x2b8   : > { %v565_v12 = vadd.f32 %v564_v11, %v468_v7  ;;  %v566_v13 = vpop.f32.mrb[5].mxu1 }
 0x2b9   : > { %v567_v14 = vadd.f32 %v566_v13, %v468_v7 }
 0x2ba   : > { %909 = vtanh.f32 %v565_v12 }
 0x2bb   : > { %v570_v15 = vpop.f32.mrb[6].mxu1  ;;  %911 = vtanh.f32 %v567_v14 }
 0x2bc   : > { %v571_v16 = vadd.f32 %v570_v15, %v472_v2  ;;  %v572_v17 = vpop.f32.mrb[7].mxu1  ;;  %v902_v19 = vpop.eup %901 }
 0x2bd   : > { %v573_v18 = vadd.f32 %v572_v17, %v472_v2  ;;  %v904_v20 = vpop.eup %903 }
 0x2be   : > { %913 = vtanh.f32 %v571_v16 }
 0x2bf   : > { %915 = vtanh.f32 %v573_v18 }
 0x2c0   : > { %v906_v21 = vpop.eup %905 }
 0x2c1   : > { %v908_v22 = vpop.eup %907  ;;  %v791_v23 = vpack.c.bf16 %v906_v21, %v902_v19 }
 0x2c2   : > { %v789_v24 = vpack.c.bf16 %v908_v22, %v904_v20 }
 0x2c4   : > { %790 = vmatprep.subr.bf16.mxu0 %v789_v24  ;;  %v910_v25 = vpop.eup %909 }
 0x2c5   : > { %792 = vmatpush1.bf16.msra.mxu0 %v791_v23  ;;  %v912_v26 = vpop.eup %911 }
 0x2c8   : > { %v914_v27 = vpop.eup %913 }
 0x2c9   : > { %v916_v28 = vpop.eup %915  ;;  %v795_v29 = vpack.c.bf16 %v914_v27, %v910_v25 }
 0x2ca   : > { %v793_v30 = vpack.c.bf16 %v916_v28, %v912_v26 }
 0x2cc   : > { %794 = vmatprep.subr.bf16.mxu0 %v793_v30 }
 0x2cd   : > { %796 = vmatpush1.bf16.msra.mxu0 %v795_v29 }
 0x2d0   : > { %766 = vmatmul.mubr.msk.f32.vlgmr.msra.gmra.mrb[8].mxu0 %vm348_vm0, %v201_v31 }
 0x3a3   : > { %v656_v33 = vpop.f32.mrb[8].mxu0 }
 0x3a4   : > { %v657_v34 = vadd.f32 %v656_v33, %v585_v32  ;;  %v658_v35 = vpop.f32.mrb[9].mxu0 }
 0x3a5   : > { %v659_v36 = vadd.f32 %v658_v35, %v585_v32 }
 0x3a6   : > { %661 = vst [vmem:[%s179_s11] sm:$0xff] %v657_v34 }
 0x3a7   : > { %662 = vst [vmem:[%s179_s11 + $0x8] sm:$0xff] %v659_v36 }
 0x3a8   : > { %958 = shalt.err (!%p955_p7)
}
 0x3a9   : > { %s959_s29 = scalar_lea.hbm %s1195_s24, 256  ;;  %s963_s5 = scalar_lea.hbm %s1240_s3, 512 }
 0x3aa   : > { %p960_p8 = scmp.ne.s32.totalorder %s1195_s24, %s959_s29  ;;  %p964_p1 = scmp.lt.u32.totalorder %s1195_s24, %s1240_s3 }
 0x3ab   : > { %p965_p0 = scmp.lt.u32.totalorder %s963_s5, %s959_s29  ;;  %p967_p6 = scmp.lt.u32.totalorder %s959_s29, %s1195_s24 }
 0x3ac   : > { %p961_p11 = pnand %p960_p8, %p1251_p9 }
 0x3ad   : > { %p966_p5 = por %p965_p0, %p964_p1 }
 0x3ae   : > { %p962_p13 = pneg %p961_p11 }
 0x3af   : > { %p968_p10 = por %p967_p6, %p966_p5 }
 0x3b1   : > { %p969_p12 = pnand %p968_p10, %p962_p13 }
 0x3b3   : > { %972 = shalt.err (!%p969_p12)
}
 0x3b4   : > { %801 = dma.vmem_to_hbm [thread:$0]  (%p1251_p9), %s1197_s17, 256, %s1195_s24, %s664_s25  }
 0x3b5 PF: > { %p813_p2 = scmp.ge.s32.totalorder %s1011_s15, 2  ;;  %s690_s8 = sand.u32 1, %s999_s12  }
 0x3b6   : > { %p1252_p3 = scmp.ne.s32.totalorder %s1245_s23, 0  ;;  %s691_s9 = scalar_lea.sflag [#allocation4], %s690_s8 }
 0x3b8   : > { %p808_p4 = pnand %p813_p2, %p1252_p3 }
 0x3ba   : > { %994 = dma.done.wait (!%p808_p4), %s691_s9, 256  }
 0x3bb   : > { %996 = vsyncadd (!%p808_p4), %s691_s9, 4294967040  ;;  %p14_p7 = scmp.ge.s32.totalorder %s1069_s18, 4   ;;  %s1253_s12 = smov %s1003_s13 }
 0x3bc   : > { %s1254_s13 = smov %s1007_s14  ;;  %s1255_s14 = smov %s1080_s21 }
 0x3bd   : > { %s1256_s15 = smov %s1069_s18  ;;  %16 = sbr.rel (!%p14_p7) target bundleno = 4 (0x4), region = 74 }
 0x3c4   :  { %696 = vsyncpa [#allocation3], 1 }
 0x3c5   :  { %698 = vsyncpa [#allocation3 + $0x1], 1 }
 0x3c6   :  { %699 = vsyncpa [#allocation4], 1 }
 0x3c7   :  { %701 = vsyncpa [#allocation4 + $0x1], 1 }

</bundles_post_ra>
